<compile_context>
chip_gen: v7x
topology: tpu7x:2x2x1
jax: 0.10.0
libtpu: 0.0.40
codegen_flags: <defaults>
</compile_context>

<pallas_src>
import jax
import jax.numpy as jnp
from jax.experimental import pallas as pl
from jax.experimental.pallas import tpu as pltpu


def _round_up(x, m):
    return ((x + m - 1) // m) * m


def _pick_tile_k(d_pad, max_tk):
    """Largest multiple of 128 <= max_tk that divides d_pad (d_pad % 128 == 0)."""
    if d_pad <= max_tk:
        return d_pad
    best = 128
    tk = 128
    while tk <= max_tk:
        if d_pad % tk == 0:
            best = tk
        tk += 128
    return best


# ---------------------------------------------------------------------------
# Kernels
# ---------------------------------------------------------------------------

def gated_head_kernel_single(x_ref, wg_ref, bg_ref, wf_ref, bf_ref, o_ref):
    """Whole D in one step: no accumulator scratch, no zero-init."""
    g = jnp.dot(x_ref[...], wg_ref[...], preferred_element_type=jnp.float32)
    g = jax.nn.sigmoid(g + bg_ref[...].astype(jnp.float32))
    h = jnp.maximum(g * x_ref[...].astype(jnp.float32), 0.0)
    out = jnp.dot(h.astype(x_ref.dtype), wf_ref[...],
                  preferred_element_type=jnp.float32)
    o_ref[...] = (out + bf_ref[...].astype(jnp.float32)).astype(o_ref.dtype)


def gated_head_kernel_multi(x_ref, xk_ref, wg_ref, bg_ref, wf_ref, bf_ref,
                            o_ref, acc_ref):
    """K-streamed path: per step one column slice of Wg / row slice of Wf."""
    k = pl.program_id(1)
    nk = pl.num_programs(1)

    @pl.when(k == 0)
    def _():
        acc_ref[...] = jnp.zeros_like(acc_ref)

    # g_k = sigmoid(x @ Wg[:, k*TK:(k+1)*TK] + bg_k)  -- full contraction over D.
    g = jnp.dot(x_ref[...], wg_ref[...], preferred_element_type=jnp.float32)
    g = jax.nn.sigmoid(g + bg_ref[...].astype(jnp.float32))

    # h_k = relu(g_k * x[:, k*TK:(k+1)*TK])   (xk_ref is the matching x slice).
    h = jnp.maximum(g * xk_ref[...].astype(jnp.float32), 0.0)

    # acc += h_k @ Wf[k*TK:(k+1)*TK, :]
    acc_ref[...] += jnp.dot(h.astype(xk_ref.dtype), wf_ref[...],
                            preferred_element_type=jnp.float32)

    @pl.when(k == nk - 1)
    def _():
        o_ref[...] = (acc_ref[...] + bf_ref[...].astype(jnp.float32)
                      ).astype(o_ref.dtype)


# ---------------------------------------------------------------------------
# Wrapper
# ---------------------------------------------------------------------------

def gated_head(x, wg, bg, wf, bf, *, tile_b=None, tile_k=None):
    """x: [B, D], wg: [D, D], bg: [D], wf: [D, O], bf: [O] -> [B, O]."""
    B, D = x.shape
    O = wf.shape[1]
    dtype = x.dtype
    itemsize = jnp.dtype(dtype).itemsize

    # Lane-dense padding of the feature dims.
    D_pad = _round_up(D, 128)
    O_pad = _round_up(O, 128)

    # dtype-correct sublane quantum (f32 -> 8, bf16 -> 16, int8/fp8 -> 32).
    sub = {4: 8, 2: 16, 1: 32}.get(itemsize, 8)

    # Generation-aware VMEM budget.
    try:
        vmem_cap = int(pltpu.get_tpu_info().vmem_capacity_bytes)
    except Exception:
        vmem_cap = 64 << 20                    # conservative fallback (v7x per-TC)
    small_vmem = vmem_cap <= (64 << 20)        # v7x-like budget
    budget = int(0.75 * vmem_cap)              # ~48 MiB on v7x, ~96 MiB on v5e/v6e
    tb_cap = 256 if small_vmem else 512
    tk_cap = 512 if small_vmem else 1024

    if tile_b is None:
        tile_b = min(_round_up(B, sub), tb_cap)
        # v7x: keep both TensorCores busy when the batch allows it.
        if small_vmem and B > sub:
            tile_b = min(tile_b, _round_up((B + 1) // 2, sub))
    tile_b = max(sub, _round_up(tile_b, sub))

    if tile_k is None:
        tile_k = _pick_tile_k(D_pad, tk_cap)
    assert D_pad % tile_k == 0 and tile_k % 128 == 0

    def footprint(tb, tk):
        return (2 * tb * D_pad * itemsize      # resident x tile (double-buffered)
                + 2 * tb * tk * itemsize       # x column slice
                + 2 * D_pad * tk * itemsize    # Wg column slice
                + 2 * tk * itemsize            # gate-bias slice
                + 2 * tk * O_pad * itemsize    # Wf row slice
                + 2 * O_pad * itemsize         # fc bias
                + 2 * tb * O_pad * itemsize    # output tile
                + tb * O_pad * 4)              # f32 accumulator scratch

    # Shrink tiles until the streamed footprint fits the budget
    # (the BlockSpecs, not vmem_limit_bytes, are what bound the footprint).
    while footprint(tile_b, tile_k) > budget and (tile_k > 128 or tile_b > sub):
        if tile_k > 128:
            tile_k = _pick_tile_k(D_pad, max(128, tile_k // 2))
        else:
            tile_b = max(sub, _round_up(tile_b // 2, sub))

    B_pad = _round_up(B, tile_b)
    n_b = B_pad // tile_b
    n_k = D_pad // tile_k

    # Zero-pad everything (zeros are neutral end-to-end: sigmoid(0)=0.5 is
    # multiplied by the zero x pad, and padded Wf/bf columns are zero).
    xp = jnp.pad(x, ((0, B_pad - B), (0, D_pad - D)))
    wgp = jnp.pad(wg, ((0, D_pad - D), (0, D_pad - D)))
    bgp = jnp.pad(bg, (0, D_pad - D)).reshape(1, D_pad)
    wfp = jnp.pad(wf, ((0, D_pad - D), (0, O_pad - O)))
    bfp = jnp.pad(bf, (0, O_pad - O)).reshape(1, O_pad)

    # Explicit VMEM limit: footprint + headroom, kept below physical capacity.
    fp = footprint(tile_b, tile_k)
    vmem_limit = max(int(1.4 * fp) + (4 << 20), 16 << 20)
    vmem_limit = min(vmem_limit, int(0.9 * vmem_cap))
    vmem_limit = min(max(vmem_limit, fp + (2 << 20)), vmem_cap)

    if n_k == 1:
        kernel = gated_head_kernel_single
        in_specs = [
            pl.BlockSpec((tile_b, D_pad), lambda i, k: (i, 0)),    # x
            pl.BlockSpec((D_pad, D_pad), lambda i, k: (0, 0)),     # Wg
            pl.BlockSpec((1, D_pad), lambda i, k: (0, 0)),         # bg
            pl.BlockSpec((D_pad, O_pad), lambda i, k: (0, 0)),     # Wf
            pl.BlockSpec((1, O_pad), lambda i, k: (0, 0)),         # bf
        ]
        operands = (xp, wgp, bgp, wfp, bfp)
        scratch = []
    else:
        kernel = gated_head_kernel_multi
        in_specs = [
            pl.BlockSpec((tile_b, D_pad), lambda i, k: (i, 0)),    # x (gate matmul)
            pl.BlockSpec((tile_b, tile_k), lambda i, k: (i, k)),   # x column slice
            pl.BlockSpec((D_pad, tile_k), lambda i, k: (0, k)),    # Wg column slice
            pl.BlockSpec((1, tile_k), lambda i, k: (0, k)),        # bg slice
            pl.BlockSpec((tile_k, O_pad), lambda i, k: (k, 0)),    # Wf row slice
            pl.BlockSpec((1, O_pad), lambda i, k: (0, 0)),         # bf
        ]
        operands = (xp, xp, wgp, bgp, wfp, bfp)
        scratch = [pltpu.VMEM((tile_b, O_pad), jnp.float32)]

    out = pl.pallas_call(
        kernel,
        out_shape=jax.ShapeDtypeStruct((B_pad, O_pad), dtype),
        grid_spec=pltpu.PrefetchScalarGridSpec(
            num_scalar_prefetch=0,
            grid=(n_b, n_k),
            in_specs=in_specs,
            out_specs=pl.BlockSpec((tile_b, O_pad), lambda i, k: (i, 0)),
            scratch_shapes=scratch,
        ),
        compiler_params=pltpu.CompilerParams(
            dimension_semantics=("parallel", "arbitrary"),
            vmem_limit_bytes=int(vmem_limit),
        ),
    )(*operands)

    return out[:B, :O]


def reference(x, wg, bg, wf, bf):
    # Pure-JAX reference at highest matmul precision (ground truth).
    g = jax.nn.sigmoid(jnp.dot(x, wg, precision="highest") + bg)
    h = jnp.maximum(g * x, 0.0)
    return jnp.dot(h, wf, precision="highest") + bf


def _make_inputs(key, B, D, O, dtype=jnp.float32):
    k_x, k_wg, k_bg, k_wf, k_bf = jax.random.split(key, 5)
    lim = 1.0 / (D ** 0.5)   # PyTorch nn.Linear-style uniform init
    x = jax.random.normal(k_x, (B, D), dtype=dtype)
    wg = jax.random.uniform(k_wg, (D, D), minval=-lim, maxval=lim, dtype=dtype)
    bg = jax.random.uniform(k_bg, (D,), minval=-lim, maxval=lim, dtype=dtype)
    wf = jax.random.uniform(k_wf, (D, O), minval=-lim, maxval=lim, dtype=dtype)
    bf = jax.random.uniform(k_bf, (O,), minval=-lim, maxval=lim, dtype=dtype)
    return x, wg, bg, wf, bf


if __name__ == "__main__":
    key = jax.random.PRNGKey(0)

    # Case 1: small head, non-128-multiple dims -> padded, single-K fast path.
    x, wg, bg, wf, bf = _make_inputs(key, B=10, D=96, O=40)
    out = jax.block_until_ready(gated_head(x, wg, bg, wf, bf))
    ref = reference(x, wg, bg, wf, bf)
    assert out.shape == (10, 40)
    # Tolerance covers default-precision MXU passes vs the f32 reference.
    assert jnp.allclose(out, ref, atol=2e-2, rtol=2e-2), "case-1 mismatch vs reference"

    # Case 2: force the K-streamed multi-step path (grid axis 1 > 1), still small.
    x2, wg2, bg2, wf2, bf2 = _make_inputs(jax.random.fold_in(key, 1), B=8, D=256, O=64)
    out2 = jax.block_until_ready(
        gated_head(x2, wg2, bg2, wf2, bf2, tile_b=8, tile_k=128))
    ref2 = reference(x2, wg2, bg2, wf2, bf2)
    assert out2.shape == (8, 64)
    assert jnp.allclose(out2, ref2, atol=2e-2, rtol=2e-2), "case-2 mismatch vs reference"

    print("KERNEL_OK")
</pallas_src>

<mosaic_0001>
module attributes {stable_mosaic.version = 11 : i64} {
  func.func @gated_head_kernel_single(%arg0: i32, %arg1: i32, %arg2: memref<8x128xf32, #tpu.memory_space<vmem>>, %arg3: memref<128x128xf32, #tpu.memory_space<vmem>>, %arg4: memref<1x128xf32, #tpu.memory_space<vmem>>, %arg5: memref<128x128xf32, #tpu.memory_space<vmem>>, %arg6: memref<1x128xf32, #tpu.memory_space<vmem>>, %arg7: memref<8x128xf32, #tpu.memory_space<vmem>>) attributes {dimension_semantics = [#tpu.dimension_semantics<parallel>, #tpu.dimension_semantics<arbitrary>], iteration_bounds = array<i64: 2, 1>, scalar_prefetch = 0 : i64, scratch_operands = 0 : i64, tpu.core_type = #tpu.core_type<tc>, window_params = [{transform_indices = @transform_0, window_bounds = array<i64: 8, 128>}, {pipeline_mode = #tpu.pipeline_mode<synchronous>, transform_indices = @transform_1, window_bounds = array<i64: 128, 128>}, {pipeline_mode = #tpu.pipeline_mode<synchronous>, transform_indices = @transform_2, window_bounds = array<i64: 1, 128>}, {pipeline_mode = #tpu.pipeline_mode<synchronous>, transform_indices = @transform_3, window_bounds = array<i64: 128, 128>}, {pipeline_mode = #tpu.pipeline_mode<synchronous>, transform_indices = @transform_4, window_bounds = array<i64: 1, 128>}, {transform_indices = @transform_5, window_bounds = array<i64: 8, 128>}]} {
    %c0 = arith.constant 0 : index
    %c0_0 = arith.constant 0 : index
    %0 = vector.load %arg2[%c0, %c0_0] : memref<8x128xf32, #tpu.memory_space<vmem>>, vector<8x128xf32>
    %c0_1 = arith.constant 0 : index
    %c0_2 = arith.constant 0 : index
    %1 = vector.load %arg3[%c0_1, %c0_2] : memref<128x128xf32, #tpu.memory_space<vmem>>, vector<128x128xf32>
    %cst = arith.constant dense<0.000000e+00> : vector<8x128xf32>
    %2 = tpu.matmul %0, %1, %cst {dimension_numbers = #tpu.dot_dimension_numbers<[1], [0], [0], [1], [0, 0, 1, 1], [], []>} : vector<8x128xf32>, vector<128x128xf32>, vector<8x128xf32> -> vector<8x128xf32>
    %c0_3 = arith.constant 0 : index
    %c0_4 = arith.constant 0 : index
    %3 = vector.load %arg4[%c0_3, %c0_4] : memref<1x128xf32, #tpu.memory_space<vmem>>, vector<1x128xf32>
    %4 = vector.broadcast %3 : vector<1x128xf32> to vector<8x128xf32>
    %5 = arith.addf %2, %4 : vector<8x128xf32>
    %6 = arith.negf %5 : vector<8x128xf32>
    %7 = math.exp %6 : vector<8x128xf32>
    %cst_5 = arith.constant 1.000000e+00 : f32
    %8 = vector.broadcast %cst_5 : f32 to vector<8x128xf32>
    %9 = arith.addf %8, %7 : vector<8x128xf32>
    %10 = arith.divf %8, %9 : vector<8x128xf32>
    %c0_6 = arith.constant 0 : index
    %c0_7 = arith.constant 0 : index
    %11 = vector.load %arg2[%c0_6, %c0_7] : memref<8x128xf32, #tpu.memory_space<vmem>>, vector<8x128xf32>
    %12 = arith.mulf %10, %11 : vector<8x128xf32>
    %cst_8 = arith.constant 0.000000e+00 : f32
    %13 = vector.broadcast %cst_8 : f32 to vector<8x128xf32>
    %14 = arith.maximumf %12, %13 : vector<8x128xf32>
    %c0_9 = arith.constant 0 : index
    %c0_10 = arith.constant 0 : index
    %15 = vector.load %arg5[%c0_9, %c0_10] : memref<128x128xf32, #tpu.memory_space<vmem>>, vector<128x128xf32>
    %cst_11 = arith.constant dense<0.000000e+00> : vector<8x128xf32>
    %16 = tpu.matmul %14, %15, %cst_11 {dimension_numbers = #tpu.dot_dimension_numbers<[1], [0], [0], [1], [0, 0, 1, 1], [], []>} : vector<8x128xf32>, vector<128x128xf32>, vector<8x128xf32> -> vector<8x128xf32>
    %c0_12 = arith.constant 0 : index
    %c0_13 = arith.constant 0 : index
    %17 = vector.load %arg6[%c0_12, %c0_13] : memref<1x128xf32, #tpu.memory_space<vmem>>, vector<1x128xf32>
    %18 = vector.broadcast %17 : vector<1x128xf32> to vector<8x128xf32>
    %19 = arith.addf %16, %18 : vector<8x128xf32>
    %c0_14 = arith.constant 0 : index
    %c0_15 = arith.constant 0 : index
    %20 = vector.load %arg7[%c0_14, %c0_15] : memref<8x128xf32, #tpu.memory_space<vmem>>, vector<8x128xf32>
    tpu.vector_store %arg7[%c0_14, %c0_15], %19 {strides = array<i32>} : memref<8x128xf32, #tpu.memory_space<vmem>>, vector<8x128xf32>,
    return
  }
  func.func @transform_0(%arg0: i32, %arg1: i32) -> (i32, i32) {
    %c0_i32 = arith.constant 0 : i32
    %c0_i32_0 = arith.constant 0 : i32
    return %arg0, %c0_i32 : i32, i32
  }
  func.func @transform_1(%arg0: i32, %arg1: i32) -> (i32, i32) {
    %c0_i32 = arith.constant 0 : i32
    %c0_i32_0 = arith.constant 0 : i32
    %c0_i32_1 = arith.constant 0 : i32
    return %c0_i32, %c0_i32_0 : i32, i32
  }
  func.func @transform_2(%arg0: i32, %arg1: i32) -> (i32, i32) {
    %c0_i32 = arith.constant 0 : i32
    %c0_i32_0 = arith.constant 0 : i32
    %c0_i32_1 = arith.constant 0 : i32
    return %c0_i32, %c0_i32_0 : i32, i32
  }
  func.func @transform_3(%arg0: i32, %arg1: i32) -> (i32, i32) {
    %c0_i32 = arith.constant 0 : i32
    %c0_i32_0 = arith.constant 0 : i32
    %c0_i32_1 = arith.constant 0 : i32
    return %c0_i32, %c0_i32_0 : i32, i32
  }
  func.func @transform_4(%arg0: i32, %arg1: i32) -> (i32, i32) {
    %c0_i32 = arith.constant 0 : i32
    %c0_i32_0 = arith.constant 0 : i32
    %c0_i32_1 = arith.constant 0 : i32
    return %c0_i32, %c0_i32_0 : i32, i32
  }
  func.func @transform_5(%arg0: i32, %arg1: i32) -> (i32, i32) {
    %c0_i32 = arith.constant 0 : i32
    %c0_i32_0 = arith.constant 0 : i32
    return %arg0, %c0_i32 : i32, i32
  }
}

</mosaic_0001>

<bundles_post_ra>
// kernel: tpu_custom_call.1
= control target key start
LH: loop header
LB: loop body
LE: loop exit
PB: predicated region body
PF: predicated region fallthrough
CT: control target
= control target key end

     0   :  { %10 = vsyncpa [#allocation3], 0  ;;  %s1341_s0 = inlined_call_operand.hbm [shape: f32[16,128], index: 0, kind: input, shape index: {}]   ;;  %s1342_s1 = inlined_call_operand.hbm [shape: f32[128,128], index: 1, kind: input, shape index: {}]   ;;  %s1343_s2 = inlined_call_operand.vmem [shape: f32[1,128], index: 2, kind: input, shape index: {}]   ;;  %s1344_s3 = inlined_call_operand.hbm [shape: f32[128,128], index: 3, kind: input, shape index: {}]   ;;  %s1345_s4 = inlined_call_operand.vmem [shape: f32[1,128], index: 4, kind: input, shape index: {}]   ;;  %s1346_s5 = inlined_call_operand.hbm [shape: f32[16,128], index: 5, kind: output, shape index: {}]  }
   0x1   :  { %12 = vsyncpa [#allocation3 + $0x1], 0 }
   0x2   :  { %13 = vsyncpa [#allocation6], 0 }
   0x3   :  { %14 = vsyncpa [#allocation4], 0 }
   0x4   :  { %16 = vsyncpa [#allocation4 + $0x1], 0  ;;  %s1062_s18 = smov 0   ;;  %s1064_s19 = smov 0  }
   0x5   :  { %s1066_s20 = smov 0   ;;  %s1068_s21 = smov 0  }
   0x6   :  { %s1070_s22 = smov 0   ;;  %s1072_s23 = smov 0  }
   0x7 LB: > { %s585_s24 = sadd.s32 4294967295, %s1021_s23   ;;  %s586_s25 = sadd.s32 4294967294, %s1021_s23   ;;  %s1021_s23 = sphi %s1072_s23, %s22_s23   ;;  %s1017_s22 = sphi %s1070_s22, %s1368_s22   ;;  %s1013_s21 = sphi %s1068_s21, %s1367_s21   ;;  %s1009_s20 = sphi %s1066_s20, %s1366_s20   ;;  %s1005_s19 = sphi %s1064_s19, %s1365_s19   ;;  %s1001_s18 = sphi %s1062_s18, %s1364_s18  }
   0x8   : > { %p54_p0 = scmp.ne.s32.totalorder %s1005_s19, %s1001_s18  ;;  %p1096_p1 = scmp.eq.s32.totalorder %s585_s24, 0 }
   0x9   : > { %p1100_p2 = scmp.eq.s32.totalorder %s585_s24, 1  ;;  %p168_p3 = scmp.eq.s32.totalorder %s586_s25, 1 }
   0xa   : > { %s1351_s26 = scalar_select %p1096_p1, 1, 0 }
   0xb   : > { %p1106_p4 = por %p1096_p1, %p54_p0  ;;  %p587_p5 = scmp.ge.s32.totalorder %s1021_s23, 1 }
   0xc   : > { %p1111_p6 = por %p168_p3, %p54_p0  ;;  %p175_p7 = scmp.lt.s32.totalorder %s1021_s23, 3 }
   0xd   : > { %s1353_s28 = scalar_select %p1106_p4, 1, 0 }
   0xe   : > { %s1354_s29 = scalar_select %p1111_p6, 1, 0 }
   0xf   : > { %p1116_p8 = pnand %p587_p5, %p175_p7  ;;  %s1023_s6 = smov [#allocation5]  }
  0x10   : > { %s187_s7 = sshll.u32 %s1023_s6, 4  ;;  %s1024_s9 = smov [#allocation7]   ;;  %s1120_s7 = int_to_ptr.vmem [resolvable:$true] %s187_s7 }
  0x11   : > { %p769_p9 = pneg %p1116_p8  ;;  %s203_s10 = sshll.u32 %s1024_s9, 4  ;;  %s1131_s10 = int_to_ptr.vmem [resolvable:$true] %s203_s10 }
  0x12   : > { %s849_s13 = scalar_lea.hbm %s1342_s1, 2048 }
  0x13   : > { %p1127_p11 = pnand %p769_p9, %p1096_p1  ;;  %p850_p12 = scmp.ne.s32.totalorder %s1342_s1, %s849_s13 }
  0x14   : > { %p856_p5 = scmp.lt.u32.totalorder %s849_s13, %s1342_s1 }
  0x15   : > { %p851_p13 = pneg %p1127_p11 }
  0x17   : > { %p852_p0 = pnand %p851_p13, %p850_p12 }
  0x19   : > { %p853_p3 = pneg %p852_p0 }
  0x1b   : > { %p858_p7 = pnand %p856_p5, %p853_p3 }
  0x1d   : > { %861 = shalt.err (!%p858_p7)
}
  0x1e   : > { %s862_s24 = scalar_lea.vmem %s1120_s7, 2048  ;;  %p870_p1 = scmp.lt.s32.totalorder %s1120_s7, %s1120_s7 }
  0x1f   : > { %p863_p9 = scmp.ne.s32.totalorder %s1120_s7, %s862_s24  ;;  %p871_p12 = scmp.lt.s32.totalorder %s862_s24, %s862_s24 }
  0x21   : > { %p865_p10 = pnand %p863_p9, %p851_p13  ;;  %p872_p0 = por %p871_p12, %p870_p1 }
  0x23   : > { %p866_p6 = pneg %p865_p10 }
  0x25   : > { %p873_p4 = pnand %p872_p0, %p866_p6 }
  0x27   : > { %876 = shalt.err (!%p873_p4)
}
  0x28   : > { %s1025_s25 = smov 128   ;;  %s1026_s6 = smov 8  }
  0x29   : > { %772 = dma.hbm_to_vmem [thread:$0]  (!%p1127_p11), %s1342_s1, 2048, %s1120_s7, [#allocation6], %s1025_s25, %s1025_s25, %s1026_s6  }
  0x2a   : > { %s877_s14 = scalar_lea.hbm %s1344_s3, 2048 }
  0x2b   : > { %p878_p1 = scmp.ne.s32.totalorder %s1344_s3, %s877_s14  ;;  %p884_p10 = scmp.lt.u32.totalorder %s877_s14, %s1344_s3 }
  0x2d   : > { %p880_p4 = pnand %p878_p1, %p851_p13 }
  0x2f   : > { %p881_p6 = pneg %p880_p4 }
  0x31   : > { %p886_p3 = pnand %p884_p10, %p881_p6 }
  0x33   : > { %889 = shalt.err (!%p886_p3)
}
  0x34   : > { %s890_s7 = scalar_lea.vmem %s1131_s10, 2048  ;;  %p898_p12 = scmp.lt.s32.totalorder %s1131_s10, %s1131_s10 }
  0x35   : > { %p891_p5 = scmp.ne.s32.totalorder %s1131_s10, %s890_s7  ;;  %p899_p0 = scmp.lt.s32.totalorder %s890_s7, %s890_s7 }
  0x37   : > { %p893_p7 = pnand %p891_p5, %p851_p13  ;;  %p900_p1 = por %p899_p0, %p898_p12 }
  0x39   : > { %p894_p9 = pneg %p893_p7 }
  0x3b   : > { %p901_p4 = pnand %p900_p1, %p894_p9 }
  0x3d   : > { %904 = shalt.err (!%p901_p4)
}
  0x3e   : > { %775 = dma.hbm_to_vmem [thread:$0]  (!%p1127_p11), %s1344_s3, 2048, %s1131_s10, [#allocation6], %s1025_s25, %s1025_s25, %s1026_s6  }
  0x3f   : > { %s34_s12 = sadd.s32 1, %s1017_s22  ;;  %s41_s13 = sadd.s32 1, %s1009_s20 }
  0x40   : > { %p36_p13 = scmp.ge.s32.totalorder %s34_s12, 2  ;;  %p48_p6 = scmp.ne.s32.totalorder %s1009_s20, %s1005_s19 }
  0x41   : > { %p49_p10 = scmp.eq.s32.totalorder %s1021_s23, 0  ;;  %p786_p3 = scmp.lt.s32.totalorder %s1021_s23, 2 }
  0x42   : > { %s1370_s12 = smov (%p36_p13, %s34_s12), 0  ;;  %p1195_p7 = por %p1100_p2, %p48_p6 }
  0x43   : > { %p50_p5 = por %p49_p10, %p48_p6  ;;  %s38_s14 = ssub.s32 %s1017_s22, %s1370_s12 }
  0x44   : > { %s1357_s8 = scalar_select %p1195_p7, 1, 0 }
  0x45   : > { %s220_s15 = sand.u32 1, %s1009_s20   ;;  %p39_p9 = scmp.eq.s32.totalorder %s38_s14, 0 }
  0x46   : > { %s591_s10 = sshll.u32 %s220_s15, 3  ;;  %s592_s25 = sshll.u32 %s1017_s22, 7 }
  0x47   : > { %s1204_s6 = scalar_select %p39_p9, %s1009_s20, %s41_s13  }
  0x48   : > { %s1209_s24 = scalar_lea.hbm %s1341_s0, %s592_s25  ;;  %s224_s27 = scalar_lea.vmem [#allocation2], %s591_s10 }
  0x49   : > { %s231_s7 = sshll.u32 %s224_s27, 4  ;;  %p1213_p2 = pnand %p786_p3, %p50_p5  ;;  %s1217_s7 = int_to_ptr.vmem [resolvable:$true] %s231_s7 }
  0x4a   : > { %s221_s11 = scalar_lea.sflag [#allocation3], %s220_s15  ;;  %s905_s13 = scalar_lea.hbm %s1209_s24, 128 }
  0x4b   : > { %p906_p11 = scmp.ne.s32.totalorder %s1209_s24, %s905_s13  ;;  %p907_p12 = pneg %p1213_p2 }
  0x4c   : > { %s910_s25 = scalar_lea.hbm %s1341_s0, 256  ;;  %p911_p4 = scmp.lt.u32.totalorder %s1209_s24, %s1341_s0 }
  0x4d   : > { %p908_p0 = pnand %p907_p12, %p906_p11  ;;  %p912_p13 = scmp.lt.u32.totalorder %s910_s25, %s905_s13 }
  0x4e   : > { %p914_p10 = scmp.lt.u32.totalorder %s905_s13, %s1209_s24 }
  0x4f   : > { %p909_p1 = pneg %p908_p0  ;;  %p913_p6 = por %p912_p13, %p911_p4 }
  0x51   : > { %p915_p3 = por %p914_p10, %p913_p6 }
  0x53   : > { %p916_p5 = pnand %p915_p3, %p909_p1 }
  0x55   : > { %919 = shalt.err (!%p916_p5)
}
  0x56   : > { %s920_s15 = scalar_lea.vmem %s1217_s7, 128  ;;  %s1027_s27 = smov [#allocation2]  }
  0x57   : > { %p921_p9 = scmp.ne.s32.totalorder %s1217_s7, %s920_s15  ;;  %s925_s14 = sshll.u32 %s1027_s27, 4  ;;  %s926_s14 = int_to_ptr.vmem [resolvable:$false] %s925_s14 }
  0x58   : > { %s927_s10 = scalar_lea.vmem %s926_s14, 256  ;;  %p928_p7 = scmp.lt.s32.totalorder %s1217_s7, %s926_s14 }
  0x59   : > { %p923_p11 = pnand %p921_p9, %p907_p12  ;;  %p929_p4 = scmp.lt.s32.totalorder %s927_s10, %s920_s15 }
  0x5b   : > { %p924_p0 = pneg %p923_p11  ;;  %p930_p13 = por %p929_p4, %p928_p7 }
  0x5d   : > { %p931_p6 = pnand %p930_p13, %p924_p0 }
  0x5f   : > { %934 = shalt.err (!%p931_p6)
}
  0x60   : > { %779 = dma.hbm_to_vmem [thread:$0]  (!%p1213_p2), %s1209_s24, 128, %s1217_s7, %s221_s11  }
  0x61   : > { %240 = sbr.rel (%p1116_p8) target bundleno = 615 (0x267), region = 40  ;;  %s1247_s13 = sand.u32 (!%p1116_p8), 1, %s1005_s19  }
  0x62   : > { %s594_s25 = sshll.u32 (!%p1116_p8), %s1247_s13, 3  ;;  %s243_s16 = scalar_lea.sflag (!%p1116_p8), [#allocation3], %s1247_s13 }
  0x63   : > { %s1253_s17 = scalar_lea.vmem (!%p1116_p8), [#allocation2], %s594_s25  ;;  %p1359_p7 = scmp.ne.s32.totalorder (!%p1116_p8), %s1353_s28, 0 }
  0x68   : > { %988 = dma.done.wait (%p1359_p7), %s243_s16, 128  }
  0x69   : > { %990 = vsyncadd (%p1359_p7), %s243_s16, 4294967168  ;;  %p1360_p2 = scmp.ne.s32.totalorder %s1351_s26, 0 }
  0x6b   : > { %992 = dma.done.wait (%p1360_p2), [#allocation6], 4096  }
  0x6c   : > { %994 = vsyncadd (%p1360_p2), [#allocation6], 4294963200  ;;  %v1028_v0 = vmov 0.0|0.0   ;;  %vm1029_vm0 = vmmov 0   ;;  %v1030_v1 = vmov 0.0   ;;  %v282_v2 = vld [vmem:[#allocation5] sm:$0xff] }
  0x6d   : > { %709 = vmatprep.subr.bf16.mxu0 %v1028_v0  ;;  %671 = vmatprep.mubr.msk.f32.mxu0 %vm1029_vm0, %v1030_v1  ;;  %v283_v3 = vld [vmem:[#allocation5 + $0x8] sm:$0xff]  ;;  %v284_v4 = vld [vmem:[#allocation5 + $0x10] sm:$0xff]  ;;  %v285_v6 = vld [vmem:[#allocation5 + $0x18] sm:$0xff]  ;;  %s602_s7 = sshll.u32 %s1013_s21, 7  ;;  %s280_s9 = scalar_lea.vmem [#allocation8], %s594_s25 }
  0x6e   : > { %733 = vmatprep.subr.bf16.mxu1 %v1028_v0  ;;  %706 = vmatprep.mubr.msk.f32.mxu1 %vm1029_vm0, %v1030_v1  ;;  %v710_v5 = vpack.c.bf16 %v283_v3, %v282_v2  ;;  %v713_v7 = vpack.c.bf16 %v285_v6, %v284_v4  ;;  %v286_v8 = vld [vmem:[#allocation5 + $0x20] sm:$0xff]  ;;  %v287_v9 = vld [vmem:[#allocation5 + $0x28] sm:$0xff]  ;;  %v288_v11 = vld [vmem:[#allocation5 + $0x30] sm:$0xff]  ;;  %s491_s11 = sshll.u32 %s280_s9, 4  ;;  %s1292_s14 = scalar_lea.hbm %s1346_s5, %s602_s7  ;;  %s1294_s11 = int_to_ptr.vmem [resolvable:$true] %s491_s11 }
  0x6f   : > { %v716_v10 = vpack.c.bf16 %v287_v9, %v286_v8  ;;  %v289_v12 = vld [vmem:[#allocation5 + $0x38] sm:$0xff]  ;;  %v290_v14 = vld [vmem:[#allocation5 + $0x40] sm:$0xff]  ;;  %v291_v15 = vld [vmem:[#allocation5 + $0x48] sm:$0xff]  ;;  %s478_s10 = scalar_lea.sflag [#allocation4], %s1247_s13  ;;  %s935_s16 = scalar_lea.vmem %s1294_s11, 128 }
  0x70   : > { %711 = vmatpush3.bf16.msra.mxu0 %v710_v5  ;;  %v719_v13 = vpack.c.bf16 %v289_v12, %v288_v11  ;;  %v722_v16 = vpack.c.bf16 %v291_v15, %v290_v14  ;;  %v292_v17 = vld [vmem:[#allocation5 + $0x50] sm:$0xff]  ;;  %v293_v18 = vld [vmem:[#allocation5 + $0x58] sm:$0xff]  ;;  %v294_v20 = vld [vmem:[#allocation5 + $0x60] sm:$0xff]  ;;  %p936_p8 = scmp.ne.s32.totalorder %s1294_s11, %s935_s16  ;;  %p1361_p12 = scmp.ne.s32.totalorder %s1357_s8, 0 }
  0x71   : > { %712 = vmatprep.subr.bf16.mxu0 %v1028_v0  ;;  %v725_v19 = vpack.c.bf16 %v293_v18, %v292_v17  ;;  %v295_v21 = vld [vmem:[#allocation5 + $0x68] sm:$0xff]  ;;  %v296_v23 = vld [vmem:[#allocation5 + $0x70] sm:$0xff]  ;;  %v297_v24 = vld [vmem:[#allocation5 + $0x78] sm:$0xff]  ;;  %s1031_s21 = smov [#allocation8]  }
  0x72   : > { %v728_v22 = vpack.c.bf16 %v295_v21, %v294_v20  ;;  %v731_v25 = vpack.c.bf16 %v297_v24, %v296_v23  ;;  %v281_v26 = vld [vmem:[%s1253_s17] sm:$0xff]  ;;  %v383_v27 = vld [vmem:[#allocation7] sm:$0xff]  ;;  %v384_v28 = vld [vmem:[#allocation7 + $0x8] sm:$0xff]  ;;  %p937_p1 = pnand %p936_p8, %p1361_p12  ;;  %s939_s25 = sshll.u32 %s1031_s21, 4  ;;  %s940_s25 = int_to_ptr.vmem [resolvable:$false] %s939_s25 }
  0x73   : > { %v734_v29 = vpack.c.bf16 %v384_v28, %v383_v27  ;;  %v385_v30 = vld [vmem:[#allocation7 + $0x10] sm:$0xff]  ;;  %v386_v31 = vld [vmem:[#allocation7 + $0x18] sm:$0xff]  ;;  %v387_v33 = vld [vmem:[#allocation7 + $0x20] sm:$0xff]  ;;  %s941_s17 = scalar_lea.vmem %s940_s25, 256  ;;  %p942_p3 = scmp.lt.s32.totalorder %s1294_s11, %s940_s25 }
  0x74   : > { %714 = vmatpush3.bf16.msra.mxu0 %v713_v7  ;;  %v737_v32 = vpack.c.bf16 %v386_v31, %v385_v30  ;;  %v388_v34 = vld [vmem:[#allocation7 + $0x28] sm:$0xff]  ;;  %v389_v36 = vld [vmem:[#allocation7 + $0x30] sm:$0xff]  ;;  %v390_v37 = vld [vmem:[#allocation7 + $0x38] sm:$0xff]  ;;  %p938_p10 = pneg %p937_p1  ;;  %p943_p5 = scmp.lt.s32.totalorder %s941_s17, %s935_s16 }
  0x75   : > { %715 = vmatprep.subr.bf16.mxu0 %v1028_v0  ;;  %735 = vmatpush3.bf16.msra.mxu1 %v734_v29  ;;  %v740_v35 = vpack.c.bf16 %v388_v34, %v387_v33  ;;  %v743_v38 = vpack.c.bf16 %v390_v37, %v389_v36  ;;  %v391_v39 = vld [vmem:[#allocation7 + $0x40] sm:$0xff]  ;;  %v392_v40 = vld [vmem:[#allocation7 + $0x48] sm:$0xff]  ;;  %v393_v42 = vld [vmem:[#allocation7 + $0x50] sm:$0xff] }
  0x76   : > { %736 = vmatprep.subr.bf16.mxu1 %v1028_v0  ;;  %v746_v41 = vpack.c.bf16 %v392_v40, %v391_v39  ;;  %v394_v43 = vld [vmem:[#allocation7 + $0x58] sm:$0xff]  ;;  %v395_v45 = vld [vmem:[#allocation7 + $0x60] sm:$0xff]  ;;  %v396_v46 = vld [vmem:[#allocation7 + $0x68] sm:$0xff]  ;;  %p944_p9 = por %p943_p5, %p942_p3 }
  0x77   : > { %v749_v44 = vpack.c.bf16 %v394_v43, %v393_v42  ;;  %v752_v47 = vpack.c.bf16 %v396_v46, %v395_v45  ;;  %v397_v48 = vld [vmem:[#allocation7 + $0x70] sm:$0xff]  ;;  %v398_v49 = vld [vmem:[#allocation7 + $0x78] sm:$0xff] }
  0x78   : > { %717 = vmatpush3.bf16.msra.mxu0 %v716_v10  ;;  %v755_v50 = vpack.c.bf16 %v398_v49, %v397_v48  ;;  %v598_v51 = vld [vmem:[%s1343_s2] ss:$0 sm:$0xff]  ;;  %p945_p11 = pnand %p944_p9, %p938_p10 }
  0x79   : > { %718 = vmatprep.subr.bf16.mxu0 %v1028_v0  ;;  %738 = vmatpush3.bf16.msra.mxu1 %v737_v32  ;;  %v600_v61 = vld [vmem:[%s1345_s4] ss:$0 sm:$0xff] }
  0x7a   : > { %739 = vmatprep.subr.bf16.mxu1 %v1028_v0 }
  0x7c   : > { %720 = vmatpush3.bf16.msra.mxu0 %v719_v13 }
  0x7d   : > { %721 = vmatprep.subr.bf16.mxu0 %v1028_v0  ;;  %741 = vmatpush3.bf16.msra.mxu1 %v740_v35 }
  0x7e   : > { %742 = vmatprep.subr.bf16.mxu1 %v1028_v0 }
  0x80   : > { %723 = vmatpush3.bf16.msra.mxu0 %v722_v16 }
  0x81   : > { %724 = vmatprep.subr.bf16.mxu0 %v1028_v0  ;;  %744 = vmatpush3.bf16.msra.mxu1 %v743_v38 }
  0x82   : > { %745 = vmatprep.subr.bf16.mxu1 %v1028_v0 }
  0x84   : > { %726 = vmatpush3.bf16.msra.mxu0 %v725_v19 }
  0x85   : > { %727 = vmatprep.subr.bf16.mxu0 %v1028_v0  ;;  %747 = vmatpush3.bf16.msra.mxu1 %v746_v41 }
  0x86   : > { %748 = vmatprep.subr.bf16.mxu1 %v1028_v0 }
  0x88   : > { %729 = vmatpush3.bf16.msra.mxu0 %v728_v22 }
  0x89   : > { %730 = vmatprep.subr.bf16.mxu0 %v1028_v0  ;;  %750 = vmatpush3.bf16.msra.mxu1 %v749_v44 }
  0x8a   : > { %751 = vmatprep.subr.bf16.mxu1 %v1028_v0 }
  0x8c   : > { %732 = vmatpush3.bf16.msra.mxu0 %v731_v25 }
  0x8d   : > { %753 = vmatpush3.bf16.msra.mxu1 %v752_v47 }
  0x8e   : > { %754 = vmatprep.subr.bf16.mxu1 %v1028_v0 }
  0x8f   : > { %672 = vmatmul.mubr.f32.vlgmr.msra.gmra.mrb[0].mxu0 %v281_v26 }
  0x91   : > { %756 = vmatpush3.bf16.msra.mxu1 %v755_v50 }
 0x162   : > { %v371_v52 = vpop.f32.mrb[0].mxu0 }
 0x163   : > { %v372_v53 = vadd.f32 %v598_v51, %v371_v52  ;;  %v673_v54 = vpop.f32.mrb[1].mxu0 }
 0x165   : > { %v599_v55 = vmul.f32 -1.442695, %v372_v53 }
 0x167   : > { %845 = vpow2.f32 %v599_v55 }
 0x171   : > { %v846_v56 = vpop.eup %845 }
 0x172   : > { %v378_v57 = vadd.f32 1.0, %v846_v56 }
 0x174   : > { %847 = vrcp.f32 %v378_v57 }
 0x17e   : > { %v848_v58 = vpop.eup %847 }
 0x17f   : > { %v381_v59 = vmul.f32 %v848_v58, %v281_v26 }
 0x181   : > { %v382_v60 = vmax.f32 %v381_v59, 0.0 }
 0x183   : > { %707 = vmatmul.mubr.f32.vlgmr.msra.gmra.mrb[0].mxu1 %v382_v60 }
 0x256   : > { %v472_v62 = vpop.f32.mrb[0].mxu1 }
 0x257   : > { %v473_v63 = vadd.f32 %v600_v61, %v472_v62  ;;  %v708_v0 = vpop.f32.mrb[1].mxu1 }
 0x259   : > { %476 = vst [vmem:[%s280_s9] sm:$0xff] %v473_v63 }
 0x25a   : > { %948 = shalt.err (!%p945_p11)
}
 0x25b   : > { %s949_s13 = scalar_lea.hbm %s1292_s14, 128  ;;  %s953_s30 = scalar_lea.hbm %s1346_s5, 256 }
 0x25c   : > { %p950_p0 = scmp.ne.s32.totalorder %s1292_s14, %s949_s13  ;;  %p954_p6 = scmp.lt.u32.totalorder %s1292_s14, %s1346_s5 }
 0x25d   : > { %p955_p7 = scmp.lt.u32.totalorder %s953_s30, %s949_s13  ;;  %p957_p8 = scmp.lt.u32.totalorder %s949_s13, %s1292_s14 }
 0x25e   : > { %p951_p4 = pnand %p950_p0, %p1361_p12 }
 0x25f   : > { %p956_p2 = por %p955_p7, %p954_p6 }
 0x260   : > { %p952_p13 = pneg %p951_p4 }
 0x261   : > { %p958_p1 = por %p957_p8, %p956_p2 }
 0x263   : > { %p959_p10 = pnand %p958_p1, %p952_p13 }
 0x265   : > { %962 = shalt.err (!%p959_p10)
}
 0x266   : > { %767 = dma.vmem_to_hbm [thread:$0]  (%p1361_p12), %s1294_s11, 128, %s1292_s14, %s478_s10  }
 0x267 PF: > { %s503_s9 = sand.u32 1, %s1001_s18   ;;  %p1362_p3 = scmp.ne.s32.totalorder %s1354_s29, 0 }
 0x268   : > { %p1363_p5 = scmp.ge.s32.totalorder %s1021_s23, 2  ;;  %s504_s15 = scalar_lea.sflag [#allocation4], %s503_s9 }
 0x26a   : > { %p781_p9 = pnand %p1363_p5, %p1362_p3 }
 0x26c   : > { %996 = dma.done.wait (!%p781_p9), %s504_s15, 128  }
 0x26d   : > { %998 = vsyncadd (!%p781_p9), %s504_s15, 4294967168  ;;  %s22_s23 = sadd.s32 1, %s1021_s23   ;;  %s1364_s18 = smov %s1005_s19 }
 0x26e   : > { %p19_p11 = scmp.ge.s32.totalorder %s22_s23, 4   ;;  %s1365_s19 = smov %s1009_s20 }
 0x26f   : > { %s1366_s20 = smov %s1204_s6  ;;  %s1367_s21 = smov %s1017_s22 }
 0x270   : > { %s1368_s22 = smov %s1370_s12  ;;  %21 = sbr.rel (!%p19_p11) target bundleno = 7 (0x7), region = 93 }
 0x277   :  { %509 = vsyncpa [#allocation3], 1 }
 0x278   :  { %511 = vsyncpa [#allocation3 + $0x1], 1 }
 0x279   :  { %512 = vsyncpa [#allocation6], 1 }
 0x27a   :  { %513 = vsyncpa [#allocation4], 1 }
 0x27b   :  { %515 = vsyncpa [#allocation4 + $0x1], 1 }

</bundles_post_ra>
